<compile_context>
chip_gen: v5e
topology: v5e:2x2
jax: 0.10.0
libtpu: 0.0.40
codegen_flags: <defaults>
</compile_context>

<pallas_src>
import jax
import jax.numpy as jnp
from jax.experimental import pallas as pl
from jax.experimental.pallas import tpu as pltpu


def _round_up(x, m):
    return (x + m - 1) // m * m


def residual_block_kernel(x_ref, w1_ref, b1_ref, w2_ref, b2_ref, o_ref):
    # x tile: [TM, Hp] f32 (streamed); w1/w2: [Hp, Hp] bf16 (VMEM-resident);
    # b1/b2: [1, Hp] f32. Two MXU matmuls (bf16 in, f32 acc), VPU elementwise f32.
    x = x_ref[...]                                           # f32 [TM, Hp]
    xb = x.astype(jnp.bfloat16)                              # MXU operand
    h = jnp.dot(xb, w1_ref[...], preferred_element_type=jnp.float32) + b1_ref[...]
    h = jnp.maximum(h, 0.0)                                  # ReLU (f32, VPU)
    y = jnp.dot(h.astype(jnp.bfloat16), w2_ref[...],
                preferred_element_type=jnp.float32) + b2_ref[...]
    o_ref[...] = (x + y).astype(o_ref.dtype)                 # exact f32 residual


def residual_block(x, w1, b1, w2, b2, *, block_rows=512):
    """x: [N, H] f32; w1, w2: [H, H] stored (in, out) so y = x @ W + b; b1, b2: [H].

    Returns f32 [N, H]. Internally pads H to a multiple of 128 (lanes) and N to
    a multiple of the row tile; padding is zero so results are unaffected.
    """
    N, H = x.shape
    Hp = _round_up(H, 128)                              # lane-dense hidden dim
    TM = min(_round_up(block_rows, 8), _round_up(N, 8)) # sublane-aligned row tile
    Np = _round_up(N, TM)

    # Pad / cast only when necessary (shapes are static, so this is a Python branch).
    if (Np, Hp) == (N, H) and x.dtype == jnp.float32:
        xp = x
    else:
        xp = jnp.zeros((Np, Hp), jnp.float32).at[:N, :H].set(x.astype(jnp.float32))
    w1p = jnp.zeros((Hp, Hp), jnp.bfloat16).at[:H, :H].set(w1.astype(jnp.bfloat16))
    w2p = jnp.zeros((Hp, Hp), jnp.bfloat16).at[:H, :H].set(w2.astype(jnp.bfloat16))
    b1p = jnp.zeros((1, Hp), jnp.float32).at[0, :H].set(b1.astype(jnp.float32))
    b2p = jnp.zeros((1, Hp), jnp.float32).at[0, :H].set(b2.astype(jnp.float32))

    grid = (Np // TM,)

    # VMEM budget: assume double-buffering on every operand (worst case).
    weights_bytes = 2 * (2 * Hp * Hp * 2)                  # W1 + W2, bf16, x2 buffers
    bias_bytes = 2 * (2 * Hp * 4)                          # b1 + b2, f32, x2 buffers
    stream_bytes = 2 * (TM * Hp * 4) + 2 * (TM * Hp * 4)   # x (f32) + out (f32), x2
    vmem_limit = min(weights_bytes + bias_bytes + stream_bytes + (8 << 20), 64 << 20)

    # Scheduler hint: two [Np,Hp]x[Hp,Hp] matmuls + streamed IO + resident weights.
    cost = pl.CostEstimate(
        flops=2 * 2 * Np * Hp * Hp,
        transcendentals=0,
        bytes_accessed=4 * Np * Hp + 4 * Np * Hp + 2 * (2 * Hp * Hp) + 2 * (4 * Hp),
    )

    out = pl.pallas_call(
        residual_block_kernel,
        out_shape=jax.ShapeDtypeStruct((Np, Hp), jnp.float32),
        grid_spec=pltpu.PrefetchScalarGridSpec(
            num_scalar_prefetch=0,
            grid=grid,
            in_specs=[
                pl.BlockSpec((TM, Hp), lambda i: (i, 0)),   # x: streamed row tiles
                pl.BlockSpec((Hp, Hp), lambda i: (0, 0)),   # W1: resident
                pl.BlockSpec((1, Hp), lambda i: (0, 0)),    # b1: resident
                pl.BlockSpec((Hp, Hp), lambda i: (0, 0)),   # W2: resident
                pl.BlockSpec((1, Hp), lambda i: (0, 0)),    # b2: resident
            ],
            out_specs=pl.BlockSpec((TM, Hp), lambda i: (i, 0)),
        ),
        compiler_params=pltpu.CompilerParams(
            dimension_semantics=("parallel",),   # independent row tiles -> megacore
            vmem_limit_bytes=vmem_limit,
        ),
        cost_estimate=cost,
    )(xp, w1p, b1p, w2p, b2p)

    if (Np, Hp) == (N, H):
        return out
    return out[:N, :H]


if __name__ == "__main__":
    hidden_dim = 32
    batch, seq = 2, 8
    N = batch * seq

    key = jax.random.PRNGKey(0)
    kx, k1w, k1b, k2w, k2b = jax.random.split(key, 5)

    # PyTorch nn.Linear default init: U(-1/sqrt(H), 1/sqrt(H)).
    # PyTorch weight is [out, in]; we store the transpose [in, out] for x @ W.
    bound = 1.0 / (hidden_dim ** 0.5)
    w1 = jax.random.uniform(k1w, (hidden_dim, hidden_dim), jnp.float32, -bound, bound)
    b1 = jax.random.uniform(k1b, (hidden_dim,), jnp.float32, -bound, bound)
    w2 = jax.random.uniform(k2w, (hidden_dim, hidden_dim), jnp.float32, -bound, bound)
    b2 = jax.random.uniform(k2b, (hidden_dim,), jnp.float32, -bound, bound)

    # Input: [batch, seq, hidden] flattened to token rows (Linear acts on last dim).
    x = jax.random.normal(kx, (batch, seq, hidden_dim), jnp.float32)
    x2d = x.reshape(N, hidden_dim)

    # Small block_rows here just to exercise a multi-step grid at demo shapes;
    # production default is block_rows=512.
    out = residual_block(x2d, w1, b1, w2, b2, block_rows=8)
    out = jax.block_until_ready(out)
    out3d = out.reshape(batch, seq, hidden_dim)

    # Reference in plain JAX with the same bf16 operand rounding as the kernel
    # (f32 residual and accumulation) — isolates kernel correctness from the
    # bf16 MXU-operand tradeoff.
    xb = x2d.astype(jnp.bfloat16).astype(jnp.float32)
    w1b = w1.astype(jnp.bfloat16).astype(jnp.float32)
    w2b = w2.astype(jnp.bfloat16).astype(jnp.float32)
    h_ref = jnp.maximum(xb @ w1b + b1, 0.0)
    h_ref = h_ref.astype(jnp.bfloat16).astype(jnp.float32)
    ref = (x2d + (h_ref @ w2b + b2)).reshape(batch, seq, hidden_dim)
    assert jnp.allclose(out3d, ref, atol=1e-2, rtol=1e-2), "mismatch vs reference"

    print("KERNEL_OK")
</pallas_src>

<mosaic_0001>
module attributes {stable_mosaic.version = 11 : i64} {
  func.func @residual_block_kernel(%arg0: i32, %arg1: memref<8x128xf32, #tpu.memory_space<vmem>>, %arg2: memref<128x128xbf16, #tpu.memory_space<vmem>>, %arg3: memref<1x128xf32, #tpu.memory_space<vmem>>, %arg4: memref<128x128xbf16, #tpu.memory_space<vmem>>, %arg5: memref<1x128xf32, #tpu.memory_space<vmem>>, %arg6: memref<8x128xf32, #tpu.memory_space<vmem>>) attributes {dimension_semantics = [#tpu.dimension_semantics<parallel>], iteration_bounds = array<i64: 2>, scalar_prefetch = 0 : i64, scratch_operands = 0 : i64, tpu.core_type = #tpu.core_type<tc>, window_params = [{transform_indices = @transform_0, window_bounds = array<i64: 8, 128>}, {pipeline_mode = #tpu.pipeline_mode<synchronous>, transform_indices = @transform_1, window_bounds = array<i64: 128, 128>}, {pipeline_mode = #tpu.pipeline_mode<synchronous>, transform_indices = @transform_2, window_bounds = array<i64: 1, 128>}, {pipeline_mode = #tpu.pipeline_mode<synchronous>, transform_indices = @transform_3, window_bounds = array<i64: 128, 128>}, {pipeline_mode = #tpu.pipeline_mode<synchronous>, transform_indices = @transform_4, window_bounds = array<i64: 1, 128>}, {transform_indices = @transform_5, window_bounds = array<i64: 8, 128>}]} {
    %c0 = arith.constant 0 : index
    %c0_0 = arith.constant 0 : index
    %0 = vector.load %arg1[%c0, %c0_0] : memref<8x128xf32, #tpu.memory_space<vmem>>, vector<8x128xf32>
    %1 = arith.truncf %0 : vector<8x128xf32> to vector<8x128xbf16>
    %c0_1 = arith.constant 0 : index
    %c0_2 = arith.constant 0 : index
    %2 = vector.load %arg2[%c0_1, %c0_2] : memref<128x128xbf16, #tpu.memory_space<vmem>>, vector<128x128xbf16>
    %cst = arith.constant dense<0.000000e+00> : vector<8x128xf32>
    %3 = tpu.matmul %1, %2, %cst {dimension_numbers = #tpu.dot_dimension_numbers<[1], [0], [0], [1], [0, 0, 1, 1], [], []>} : vector<8x128xbf16>, vector<128x128xbf16>, vector<8x128xf32> -> vector<8x128xf32>
    %c0_3 = arith.constant 0 : index
    %c0_4 = arith.constant 0 : index
    %4 = vector.load %arg3[%c0_3, %c0_4] : memref<1x128xf32, #tpu.memory_space<vmem>>, vector<1x128xf32>
    %5 = vector.broadcast %4 : vector<1x128xf32> to vector<8x128xf32>
    %6 = arith.addf %3, %5 : vector<8x128xf32>
    %cst_5 = arith.constant 0.000000e+00 : f32
    %7 = vector.broadcast %cst_5 : f32 to vector<8x128xf32>
    %8 = arith.maximumf %6, %7 : vector<8x128xf32>
    %9 = arith.truncf %8 : vector<8x128xf32> to vector<8x128xbf16>
    %c0_6 = arith.constant 0 : index
    %c0_7 = arith.constant 0 : index
    %10 = vector.load %arg4[%c0_6, %c0_7] : memref<128x128xbf16, #tpu.memory_space<vmem>>, vector<128x128xbf16>
    %cst_8 = arith.constant dense<0.000000e+00> : vector<8x128xf32>
    %11 = tpu.matmul %9, %10, %cst_8 {dimension_numbers = #tpu.dot_dimension_numbers<[1], [0], [0], [1], [0, 0, 1, 1], [], []>} : vector<8x128xbf16>, vector<128x128xbf16>, vector<8x128xf32> -> vector<8x128xf32>
    %c0_9 = arith.constant 0 : index
    %c0_10 = arith.constant 0 : index
    %12 = vector.load %arg5[%c0_9, %c0_10] : memref<1x128xf32, #tpu.memory_space<vmem>>, vector<1x128xf32>
    %13 = vector.broadcast %12 : vector<1x128xf32> to vector<8x128xf32>
    %14 = arith.addf %11, %13 : vector<8x128xf32>
    %15 = arith.addf %0, %14 : vector<8x128xf32>
    %c0_11 = arith.constant 0 : index
    %c0_12 = arith.constant 0 : index
    %16 = vector.load %arg6[%c0_11, %c0_12] : memref<8x128xf32, #tpu.memory_space<vmem>>, vector<8x128xf32>
    tpu.vector_store %arg6[%c0_11, %c0_12], %15 {strides = array<i32>} : memref<8x128xf32, #tpu.memory_space<vmem>>, vector<8x128xf32>,
    return
  }
  func.func @transform_0(%arg0: i32) -> (i32, i32) {
    %c0_i32 = arith.constant 0 : i32
    %c0_i32_0 = arith.constant 0 : i32
    return %arg0, %c0_i32 : i32, i32
  }
  func.func @transform_1(%arg0: i32) -> (i32, i32) {
    %c0_i32 = arith.constant 0 : i32
    %c0_i32_0 = arith.constant 0 : i32
    %c0_i32_1 = arith.constant 0 : i32
    return %c0_i32, %c0_i32_0 : i32, i32
  }
  func.func @transform_2(%arg0: i32) -> (i32, i32) {
    %c0_i32 = arith.constant 0 : i32
    %c0_i32_0 = arith.constant 0 : i32
    %c0_i32_1 = arith.constant 0 : i32
    return %c0_i32, %c0_i32_0 : i32, i32
  }
  func.func @transform_3(%arg0: i32) -> (i32, i32) {
    %c0_i32 = arith.constant 0 : i32
    %c0_i32_0 = arith.constant 0 : i32
    %c0_i32_1 = arith.constant 0 : i32
    return %c0_i32, %c0_i32_0 : i32, i32
  }
  func.func @transform_4(%arg0: i32) -> (i32, i32) {
    %c0_i32 = arith.constant 0 : i32
    %c0_i32_0 = arith.constant 0 : i32
    %c0_i32_1 = arith.constant 0 : i32
    return %c0_i32, %c0_i32_0 : i32, i32
  }
  func.func @transform_5(%arg0: i32) -> (i32, i32) {
    %c0_i32 = arith.constant 0 : i32
    %c0_i32_0 = arith.constant 0 : i32
    return %arg0, %c0_i32 : i32, i32
  }
}

</mosaic_0001>

<bundles_post_ra>
// kernel: tpu_custom_call.1
= control target key start
LH: loop header
LB: loop body
LE: loop exit
PB: predicated region body
PF: predicated region fallthrough
CT: control target
= control target key end

     0   :  { %10 = vsyncpa [#allocation3], 0  ;;  %s1069_s0 = inlined_call_operand.hbm [shape: f32[16,128], index: 0, kind: input, shape index: {}]   ;;  %s1070_s1 = inlined_call_operand.hbm [shape: bf16[128,128], index: 1, kind: input, shape index: {}]   ;;  %s1071_s2 = inlined_call_operand.vmem [shape: f32[1,128], index: 2, kind: input, shape index: {}]   ;;  %s1072_s3 = inlined_call_operand.hbm [shape: bf16[128,128], index: 3, kind: input, shape index: {}]   ;;  %s1073_s4 = inlined_call_operand.vmem [shape: f32[1,128], index: 4, kind: input, shape index: {}]   ;;  %s1074_s5 = inlined_call_operand.hbm [shape: f32[16,128], index: 5, kind: output, shape index: {}]  }
   0x1   :  { %12 = vsyncpa [#allocation3 + $0x1], 0 }
   0x2   :  { %13 = vsyncpa [#allocation6], 0 }
   0x3   :  { %14 = vsyncpa [#allocation4], 0 }
   0x4   :  { %16 = vsyncpa [#allocation4 + $0x1], 0  ;;  %s911_s18 = smov 0   ;;  %s913_s19 = smov 0  }
   0x5   :  { %s915_s20 = smov 0   ;;  %s917_s21 = smov 0  }
   0x6 LB: > { %s174_s24 = sshll.u32 %s1070_s1, 4  ;;  %s935_s25 = sadd.s32 4294967295, %s875_s21   ;;  %s875_s21 = sphi %s917_s21, %s1085_s21   ;;  %s871_s20 = sphi %s915_s20, %s1084_s20   ;;  %s867_s19 = sphi %s913_s19, %s1083_s19   ;;  %s863_s18 = sphi %s911_s18, %s1082_s18   ;;  %s175_s24 = int_to_ptr.hbm [resolvable:$true] %s174_s24 }
   0x7   : > { %p549_p0 = scmp.ge.s32.totalorder %s875_s21, 1  ;;  %p43_p1 = scmp.eq.s32.totalorder %s935_s25, 0 }
   0x8   : > { %p163_p2 = scmp.lt.s32.totalorder %s875_s21, 3  ;;  %s877_s27 = smov [#allocation5]  }
   0x9   : > { %s176_s28 = sshll.u32 %s877_s27, 4  ;;  %s191_s6 = sshll.u32 %s1072_s3, 4  ;;  %s177_s28 = int_to_ptr.vmem [resolvable:$true] %s176_s28  ;;  %s192_s6 = int_to_ptr.hbm [resolvable:$true] %s191_s6 }
   0xa   : > { %p940_p3 = pnand %p549_p0, %p163_p2  ;;  %s878_s7 = smov [#allocation7]  }
   0xb   : > { %s193_s8 = sshll.u32 %s878_s7, 4  ;;  %s879_s9 = smov 64   ;;  %s194_s8 = int_to_ptr.vmem [resolvable:$true] %s193_s8 }
   0xc   : > { %p656_p4 = pneg %p940_p3  ;;  %s880_s10 = smov 4  }
   0xd   : > { %s548_s11 = sadd.s32 4294967294, %s875_s21   ;;  %s954_s12 = sadd.s32 1, %s875_s21  }
   0xe   : > { %p657_p6 = pnand %p656_p4, %p43_p1  ;;  %s26_s13 = ssub.s32 %s875_s21, %s954_s12 }
   0xf   : > { %s29_s14 = sadd.s32 1, %s871_s20  ;;  %p27_p7 = scmp.eq.s32.totalorder %s26_s13, 0 }
  0x10   : > { %659 = dma.hbm_to_vmem [thread:$0]  (!%p657_p6), %s175_s24, 1024, %s177_s28, [#allocation6], %s879_s9, %s879_s9, %s880_s10  }
  0x11   : > { %662 = dma.hbm_to_vmem [thread:$0]  (!%p657_p6), %s192_s6, 1024, %s194_s8, [#allocation6], %s879_s9, %s879_s9, %s880_s10  }
  0x12   : > { %p36_p8 = scmp.ne.s32.totalorder %s871_s20, %s867_s19  ;;  %p37_p9 = scmp.eq.s32.totalorder %s875_s21, 0 }
  0x13   : > { %p42_p10 = scmp.ne.s32.totalorder %s867_s19, %s863_s18  ;;  %p150_p13 = scmp.eq.s32.totalorder %s935_s25, 1 }
  0x14   : > { %s965_s15 = scalar_select %p27_p7, %s871_s20, %s29_s14  }
  0x15   : > { %p967_p11 = por %p37_p9, %p36_p8  ;;  %p973_p12 = por %p43_p1, %p42_p10 }
  0x16   : > { %p156_p0 = scmp.eq.s32.totalorder %s548_s11, 1  ;;  %p673_p2 = scmp.lt.s32.totalorder %s875_s21, 2 }
  0x17   : > { %s210_s22 = sand.u32 1, %s871_s20   ;;  %p980_p4 = por %p150_p13, %p36_p8 }
  0x18   : > { %p984_p6 = por %p156_p0, %p42_p10  ;;  %s553_s27 = sshll.u32 %s210_s22, 3 }
  0x19   : > { %s554_s28 = sshll.u32 %s875_s21, 3  ;;  %s214_s7 = scalar_lea.vmem [#allocation2], %s553_s27 }
  0x1a   : > { %s218_s6 = scalar_lea.hbm %s1069_s0, %s554_s28  ;;  %s222_s8 = sshll.u32 %s214_s7, 4  ;;  %s223_s8 = int_to_ptr.vmem [resolvable:$true] %s222_s8 }
  0x1b   : > { %s220_s9 = sshll.u32 %s218_s6, 4  ;;  %p994_p7 = pnand %p673_p2, %p967_p11  ;;  %s221_s9 = int_to_ptr.hbm [resolvable:$true] %s220_s9 }
  0x1c   : > { %s211_s11 = scalar_lea.sflag [#allocation3], %s210_s22  ;;  %s775_s13 = sshra.s32 %s221_s9, 4  ;;  %s776_s13 = int_to_ptr.hbm [resolvable:$true] %s775_s13 }
  0x1d   : > { %s777_s14 = scalar_lea.hbm %s776_s13, 8  ;;  %p779_p9 = pneg %p994_p7 }
  0x1e   : > { %p778_p8 = scmp.ne.s32.totalorder %s776_s13, %s777_s14  ;;  %s782_s29 = scalar_lea.hbm %s1069_s0, 16 }
  0x1f   : > { %p783_p11 = scmp.lt.s32.totalorder %s776_s13, %s1069_s0  ;;  %p784_p0 = scmp.lt.s32.totalorder %s782_s29, %s777_s14 }
  0x20   : > { %p780_p10 = pnand %p779_p9, %p778_p8 }
  0x21   : > { %p785_p2 = por %p784_p0, %p783_p11 }
  0x22   : > { %p781_p13 = pneg %p780_p10 }
  0x24   : > { %p786_p5 = pnand %p785_p2, %p781_p13 }
  0x26   : > { %789 = shalt.err (!%p786_p5)
}
  0x27   : > { %666 = dma.hbm_to_vmem [thread:$0]  (!%p994_p7), %s221_s9, 128, %s223_s8, %s211_s11  }
  0x28   : > { %231 = sbr.rel (%p940_p3) target bundleno = 346 (0x15a), region = 40  ;;  %s1011_s22 = sand.u32 (!%p940_p3), 1, %s867_s19  }
  0x29   : > { %s556_s6 = sshll.u32 (!%p940_p3), %s1011_s22, 3  ;;  %s234_s7 = scalar_lea.sflag (!%p940_p3), [#allocation3], %s1011_s22 }
  0x2a   : > { %s1017_s13 = scalar_lea.vmem (!%p940_p3), [#allocation2], %s556_s6 }
  0x2d   : > { %850 = dma.done.wait (%p973_p12), %s234_s7, 128  }
  0x2e   : > { %852 = vsyncadd (%p973_p12), %s234_s7, 4294967168 }
  0x2f   : > { %854 = dma.done.wait (%p43_p1), [#allocation6], 2048  }
  0x30   : > { %856 = vsyncadd (%p43_p1), [#allocation6], 4294965248  ;;  %v635_v0 = vld [vmem:[#allocation5 + $0x38] sm:$0xff]  ;;  %v634_v1 = vld [vmem:[#allocation5 + $0x30] sm:$0xff]  ;;  %s625_s8 = sshll.u32 %s935_s25, 3  ;;  %s274_s28 = scalar_lea.vmem [#allocation8], %s556_s6 }
  0x31   : > { %345 = vmatpush.bf16.msra.mxu0 %v635_v0  ;;  %v643_v2 = vld [vmem:[#allocation7 + $0x38] sm:$0xff]  ;;  %v642_v3 = vld [vmem:[#allocation7 + $0x30] sm:$0xff]  ;;  %v633_v4 = vld [vmem:[#allocation5 + $0x28] sm:$0xff]  ;;  %s454_s27 = scalar_lea.hbm %s1074_s5, %s625_s8  ;;  %s456_s29 = sshll.u32 %s274_s28, 4  ;;  %s457_s29 = int_to_ptr.vmem [resolvable:$true] %s456_s29 }
  0x32   : > { %428 = vmatpush.bf16.msra.mxu1 %v643_v2  ;;  %v641_v5 = vld [vmem:[#allocation7 + $0x28] sm:$0xff]  ;;  %v632_v6 = vld [vmem:[#allocation5 + $0x20] sm:$0xff]  ;;  %v631_v8 = vld [vmem:[#allocation5 + $0x18] sm:$0xff]  ;;  %s458_s30 = sshll.u32 %s454_s27, 4  ;;  %s444_s25 = scalar_lea.sflag [#allocation4], %s1011_s22  ;;  %s459_s30 = int_to_ptr.hbm [resolvable:$true] %s458_s30 }
  0x33   : > { %v640_v7 = vld [vmem:[#allocation7 + $0x20] sm:$0xff]  ;;  %v639_v9 = vld [vmem:[#allocation7 + $0x18] sm:$0xff]  ;;  %v630_v10 = vld [vmem:[#allocation5 + $0x10] sm:$0xff]  ;;  %s819_s16 = sshra.s32 %s459_s30, 4  ;;  %s825_s17 = scalar_lea.hbm %s1074_s5, 16  ;;  %s820_s16 = int_to_ptr.hbm [resolvable:$true] %s819_s16 }
  0x34   : > { %v638_v11 = vld [vmem:[#allocation7 + $0x10] sm:$0xff]  ;;  %v629_v12 = vld [vmem:[#allocation5 + $0x8] sm:$0xff]  ;;  %v628_v13 = vld [vmem:[#allocation5] sm:$0xff]  ;;  %s821_s7 = scalar_lea.hbm %s820_s16, 8  ;;  %p826_p12 = scmp.lt.s32.totalorder %s820_s16, %s1074_s5 }
  0x35   : > { %346 = vmatpush.bf16.msra.mxu0 %v634_v1  ;;  %v275_v14 = vld [vmem:[%s1017_s13] sm:$0xff]  ;;  %v637_v16 = vld [vmem:[#allocation7 + $0x8] sm:$0xff]  ;;  %v636_v17 = vld [vmem:[#allocation7] sm:$0xff]  ;;  %p822_p1 = scmp.ne.s32.totalorder %s820_s16, %s821_s7  ;;  %p827_p7 = scmp.lt.s32.totalorder %s825_s17, %s821_s7 }
  0x36   : > { %429 = vmatpush.bf16.msra.mxu1 %v642_v3  ;;  %v276_v15 = vpack.c.bf16 %v275_v14, %v275_v14  ;;  %v713_v18 = vld [vmem:[%s1071_s2] ss:$0 sm:$0xff] }
  0x37   : > { %v714_v24 = vld [vmem:[%s1073_s4] ss:$0 sm:$0xff]  ;;  %p823_p3 = pnand %p822_p1, %p980_p4  ;;  %p828_p8 = por %p827_p7, %p826_p12 }
  0x39   : > { %347 = vmatpush.bf16.msra.mxu0 %v633_v4  ;;  %p824_p5 = pneg %p823_p3 }
  0x3a   : > { %430 = vmatpush.bf16.msra.mxu1 %v641_v5 }
  0x3b   : > { %p829_p9 = pnand %p828_p8, %p824_p5 }
  0x3d   : > { %348 = vmatpush.bf16.msra.mxu0 %v632_v6 }
  0x3e   : > { %431 = vmatpush.bf16.msra.mxu1 %v640_v7 }
  0x41   : > { %349 = vmatpush.bf16.msra.mxu0 %v631_v8 }
  0x42   : > { %432 = vmatpush.bf16.msra.mxu1 %v639_v9 }
  0x45   : > { %350 = vmatpush.bf16.msra.mxu0 %v630_v10 }
  0x46   : > { %433 = vmatpush.bf16.msra.mxu1 %v638_v11 }
  0x49   : > { %351 = vmatpush.bf16.msra.mxu0 %v629_v12 }
  0x4a   : > { %434 = vmatpush.bf16.msra.mxu1 %v637_v16 }
  0x4d   : > { %352 = vmatpush.bf16.msra.mxu0 %v628_v13 }
  0x4e   : > { %435 = vmatpush.bf16.msra.mxu1 %v636_v17 }
  0x50   : > { %353 = vmatmul.bf16.vlgmr.msra.gmra.mxu0 %v276_v15 }
  0xcd   : > { %v354_v19 = vpop.f32.mrf.mxu0 }
  0xce   : > { %v355_v20 = vadd.f32 %v713_v18, %v354_v19 }
  0xd0   : > { %v358_v21 = vmax.f32 %v355_v20, 0.0 }
  0xd2   : > { %v359_v22 = vpack.c.bf16 %v358_v21, %v358_v21 }
  0xd4   : > { %436 = vmatmul.bf16.vlgmr.msra.gmra.mxu1 %v359_v22 }
  0xd5   : > { %v356_v23 = vpop.f32.mrf.mxu0 }
 0x151   : > { %v437_v25 = vpop.f32.mrf.mxu1 }
 0x152   : > { %v438_v26 = vadd.f32 %v714_v24, %v437_v25 }
 0x154   : > { %v441_v27 = vadd.f32 %v438_v26, %v275_v14 }
 0x156   : > { %442 = vst [vmem:[%s274_s28] sm:$0xff] %v441_v27 }
 0x157   : > { %832 = shalt.err (!%p829_p9)
}
 0x158   : > { %654 = dma.vmem_to_hbm [thread:$0]  (%p980_p4), %s457_s29, 128, %s459_s30, %s444_s25  }
 0x159   : > { %v439_v28 = vpop.f32.mrf.mxu1 }
 0x15a PF: > { %s470_s22 = sand.u32 1, %s863_s18   ;;  %p1081_p10 = scmp.ge.s32.totalorder %s875_s21, 2 }
 0x15b   : > { %s471_s9 = scalar_lea.sflag [#allocation4], %s470_s22 }
 0x15c   : > { %p668_p13 = pnand %p1081_p10, %p984_p6 }
 0x15e   : > { %p669_p11 = pneg %p668_p13 }
 0x160   : > { %858 = dma.done.wait (%p669_p11), %s471_s9, 128  }
 0x161   : > { %860 = vsyncadd (%p669_p11), %s471_s9, 4294967168  ;;  %p19_p0 = scmp.ge.s32.totalorder %s954_s12, 4   ;;  %s1082_s18 = smov %s867_s19 }
 0x162   : > { %s1083_s19 = smov %s871_s20  ;;  %s1084_s20 = smov %s965_s15 }
 0x163   : > { %s1085_s21 = smov %s954_s12  ;;  %21 = sbr.rel (!%p19_p0) target bundleno = 6 (0x6), region = 93 }
 0x168   :  { %477 = vsyncpa [#allocation3], 1 }
 0x169   :  { %479 = vsyncpa [#allocation3 + $0x1], 1 }
 0x16a   :  { %480 = vsyncpa [#allocation6], 1 }
 0x16b   :  { %481 = vsyncpa [#allocation4], 1 }
 0x16c   :  { %483 = vsyncpa [#allocation4 + $0x1], 1 }

</bundles_post_ra>
